<compile_context>
chip_gen: v7x
topology: tpu7x:2x2x1
jax: 0.10.0
libtpu: 0.0.40
codegen_flags: <defaults>
</compile_context>

<pallas_src>
import functools
import math

import jax
import jax.numpy as jnp
import numpy as np
from jax.experimental import pallas as pl
from jax.experimental.pallas import tpu as pltpu


_LANE = 128      # TPU lane width; the matmul-M tile is always a multiple of this
_TM_MAX = 1024   # upper bound on the per-step M tile (rows of N*OH*OW)


def _round_up(x, m):
    return ((x + m - 1) // m) * m


def _pick_tm(M):
    """Largest multiple of 128 <= _TM_MAX that still leaves >= 4 grid steps."""
    tm = ((M // 4) // _LANE) * _LANE
    return max(_LANE, min(_TM_MAX, tm))


# ----------------------------- Pallas kernel -------------------------------

def _conv_matmul_kernel(w_ref, b_ref, p_ref, o_ref):
    """One fused (transposed) im2col-matmul tile.

    w_ref: (Cout, K2C)  bf16 flattened conv weights (constant index_map -> resident)
    b_ref: (Cout, 1)    f32 bias column (zeros when bias is None)
    p_ref: (K2C, TM)    bf16 transposed patch tile (batch+spatial rows on lanes)
    o_ref: (Cout, TM)   bf16 lane-dense output tile (no channel padding)
    """
    acc = jnp.dot(w_ref[...], p_ref[...], preferred_element_type=jnp.float32)
    o_ref[...] = (acc + b_ref[...]).astype(o_ref.dtype)


# ------------------------------- conv wrapper -------------------------------

def _im2col_t(x_nchw, K, stride, padding, dilation):
    """NCHW -> (K*K*Cin, N*OH*OW) transposed patch matrix (layout plumbing, XLA)."""
    N, Cin, H, W = x_nchw.shape
    x = jnp.transpose(x_nchw, (1, 0, 2, 3))                          # (Cin, N, H, W)
    xp = jnp.pad(x, ((0, 0), (0, 0), (padding, padding), (padding, padding)))
    OH = (H + 2 * padding - dilation * (K - 1) - 1) // stride + 1
    OW = (W + 2 * padding - dilation * (K - 1) - 1) // stride + 1
    taps = []
    for kh in range(K):
        for kw in range(K):
            h0 = kh * dilation
            w0 = kw * dilation
            taps.append(xp[:, :, h0:h0 + (OH - 1) * stride + 1:stride,
                               w0:w0 + (OW - 1) * stride + 1:stride])
    patches = jnp.stack(taps, axis=0)                                # (K*K, Cin, N, OH, OW)
    return patches.reshape(K * K * Cin, N * OH * OW), OH, OW


@functools.partial(jax.jit, static_argnames=("stride", "padding", "dilation"))
def conv2d_pallas(x_nchw, w_oihw, bias, *, stride=1, padding=0, dilation=1):
    """conv2d (groups=1) with NCHW in/out; MXU work done in a Pallas TPU kernel."""
    # TODO(synk): groups > 1 not implemented (module default is groups=1).
    N, Cin, H, W = x_nchw.shape
    Cout, _, K, _ = w_oihw.shape

    # bf16 MXU operands: cast activations BEFORE im2col so the K*K-duplicated
    # patch tensor in HBM is bf16, not f32.
    patches_t, OH, OW = _im2col_t(x_nchw.astype(jnp.bfloat16), K, stride,
                                  padding, dilation)                 # (K2C, M) bf16
    M = N * OH * OW
    K2C = K * K * Cin
    TM = _pick_tm(M)
    Mp = _round_up(M, TM)
    patches_t = jnp.pad(patches_t, ((0, 0), (0, Mp - M)))

    # (Cout, Cin, K, K) -> (Cout, K, K, Cin) -> (Cout, K*K*Cin), cast once.
    w_flat = jnp.transpose(w_oihw, (0, 2, 3, 1)).reshape(Cout, K2C)
    w_flat = w_flat.astype(jnp.bfloat16)

    if bias is None:
        b_col = jnp.zeros((Cout, 1), jnp.float32)
    else:
        b_col = bias.reshape(Cout, 1).astype(jnp.float32)

    # NOTE: the weight/bias blocks have constant index maps, so the pipeline
    # only DMAs them once; they are tiny so default buffering is harmless.
    out_t = pl.pallas_call(
        _conv_matmul_kernel,
        out_shape=jax.ShapeDtypeStruct((Cout, Mp), jnp.bfloat16),
        grid_spec=pltpu.PrefetchScalarGridSpec(
            num_scalar_prefetch=0,
            grid=(Mp // TM,),
            in_specs=[
                pl.BlockSpec((Cout, K2C), lambda i: (0, 0)),    # whole weight
                pl.BlockSpec((Cout, 1), lambda i: (0, 0)),      # bias column
                pl.BlockSpec((K2C, TM), lambda i: (0, i)),      # patch tile
            ],
            out_specs=pl.BlockSpec((Cout, TM), lambda i: (0, i)),
        ),
        compiler_params=pltpu.CompilerParams(
            dimension_semantics=("parallel",),
            vmem_limit_bytes=32 * 1024 * 1024),
    )(w_flat, b_col, patches_t)

    # Padded tail columns M..Mp hold bias values (zero-patches @ W + b); sliced off.
    # TODO(synk): consumers that accept (Cout, N*OH*OW) bf16 directly could skip
    # this epilogue reshape/transpose/cast entirely.
    out = out_t[:, :M].reshape(Cout, N, OH, OW).astype(x_nchw.dtype)
    return jnp.transpose(out, (1, 0, 2, 3))                          # back to NCHW


# ----------------------- AdaAggLayer params / forward ----------------------

def init_ada_agg_params(key, in_planes, out_planes, kernel_size, experts=5,
                        bias=True, align=True):
    """Deterministic parameter init mirroring the module's shapes."""
    k_w, k_sw, k_b, k_sb = jax.random.split(key, 4)
    fan_in = in_planes * kernel_size * kernel_size

    # experts' weights: kaiming_uniform-style bound sqrt(6/fan_in)
    bw = math.sqrt(6.0 / fan_in)
    weight = jax.random.uniform(
        k_w, (experts, out_planes, in_planes, kernel_size, kernel_size),
        jnp.float32, -bw, bw)

    # shared weight: kaiming_uniform(a=sqrt(5)) -> bound sqrt(1/fan_in)
    bsw = math.sqrt(1.0 / fan_in)
    s_weight = jax.random.uniform(
        k_sw, (out_planes, in_planes, kernel_size, kernel_size),
        jnp.float32, -bsw, bsw)

    params = {"weight": weight, "s_weight": s_weight}

    if bias:
        bb = 1.0 / math.sqrt(fan_in)
        params["bias"] = jax.random.uniform(
            k_b, (experts, out_planes), jnp.float32, -bb, bb)
        params["s_bias"] = jax.random.uniform(
            k_sb, (out_planes,), jnp.float32, -bb, bb)
    else:
        params["bias"] = None
        params["s_bias"] = None

    if align and kernel_size > 1:
        # identity-per-expert 1x1 align conv, stored as (experts, Cout, Cout)
        eye = jnp.eye(out_planes, dtype=jnp.float32)
        params["align_conv"] = jnp.broadcast_to(
            eye, (experts, out_planes, out_planes))
    else:
        params["align_conv"] = None
    return params


def ada_agg_forward(params, x, expert_i, *, stride=1, padding=0, dilation=1,
                    replace_pro=0.2, replace_draw=1.0):
    """Forward pass of AdaAggLayer.

    expert_i: Python int (0 => shared weights, i>0 => expert i-1).
    replace_draw: deterministic stand-in for python random.random().
    """
    s_weight = params["s_weight"]
    K = s_weight.shape[-1]

    if expert_i == 0:
        w = s_weight
        b = params["s_bias"]
    else:
        e = expert_i - 1
        if replace_draw < replace_pro:
            if params["align_conv"] is not None and K > 1:
                # grouped 1x1 align conv over the expert-expanded shared weight
                # == per-expert (Cout x Cout) mixing of s_weight's out channels.
                # Contract ONLY the selected expert (no (experts,...) intermediate).
                w = jnp.einsum("oi,ichw->ochw", params["align_conv"][e], s_weight,
                               precision=jax.lax.Precision.HIGHEST)
            else:
                w = s_weight
            # TODO(synk): PyTorch passes s_bias[expert_i] (a 0-d scalar) to
            # F.conv2d here, which is not a valid conv bias; we pass the full
            # s_bias vector instead.
            b = params["s_bias"]
        else:
            w = params["weight"][e]
            b = None if params["bias"] is None else params["bias"][e]

    return conv2d_pallas(x, w, b, stride=stride, padding=padding,
                         dilation=dilation)


# ----------------------------------- main -----------------------------------

def _reference_conv(x, w, b, stride, padding, dilation, *, cast_bf16=False):
    if cast_bf16:
        x = x.astype(jnp.bfloat16)
        w = w.astype(jnp.bfloat16)
    out = jax.lax.conv_general_dilated(
        x, w, window_strides=(stride, stride),
        padding=[(padding, padding), (padding, padding)],
        rhs_dilation=(dilation, dilation),
        dimension_numbers=("NCHW", "OIHW", "NCHW"),
        preferred_element_type=jnp.float32)
    if b is not None:
        out = out + b[None, :, None, None].astype(jnp.float32)
    return out


if __name__ == "__main__":
    key = jax.random.PRNGKey(0)
    k_params, k_x = jax.random.split(key)

    in_planes, out_planes, kernel_size = 4, 8, 3
    stride, padding, dilation = 1, 1, 1
    experts = 5

    params = init_ada_agg_params(k_params, in_planes, out_planes, kernel_size,
                                 experts=experts, bias=True, align=True)

    x = jax.random.normal(k_x, (2, in_planes, 16, 16), jnp.float32)

    # expert path (expert_i=2 -> weight[1], bias[1]); deterministic "no replace"
    y_expert = ada_agg_forward(params, x, expert_i=2, stride=stride,
                               padding=padding, dilation=dilation,
                               replace_pro=0.2, replace_draw=0.9)
    y_expert = jax.block_until_ready(y_expert)

    # shared path (expert_i=0 -> s_weight, s_bias)
    y_shared = ada_agg_forward(params, x, expert_i=0, stride=stride,
                               padding=padding, dilation=dilation)
    y_shared = jax.block_until_ready(y_shared)

    # replace/align path (identity align_conv -> must match the shared path)
    y_replace = ada_agg_forward(params, x, expert_i=2, stride=stride,
                                padding=padding, dilation=dilation,
                                replace_pro=0.2, replace_draw=0.1)
    y_replace = jax.block_until_ready(y_replace)

    # check vs a reference using the same bf16 MXU operands / f32 accumulation
    # (kernel additionally rounds the stored output to bf16 -> ~0.4% max rel).
    ref_expert_bf16 = _reference_conv(x, params["weight"][1], params["bias"][1],
                                      stride, padding, dilation, cast_bf16=True)
    ref_shared_bf16 = _reference_conv(x, params["s_weight"], params["s_bias"],
                                      stride, padding, dilation, cast_bf16=True)
    np.testing.assert_allclose(np.asarray(y_expert), np.asarray(ref_expert_bf16),
                               rtol=1e-2, atol=1e-2)
    np.testing.assert_allclose(np.asarray(y_shared), np.asarray(ref_shared_bf16),
                               rtol=1e-2, atol=1e-2)
    np.testing.assert_allclose(np.asarray(y_replace), np.asarray(y_shared),
                               rtol=1e-2, atol=1e-2)

    # loose check vs the pure-f32 reference (bf16 operand + output rounding only)
    ref_expert_f32 = _reference_conv(x, params["weight"][1], params["bias"][1],
                                     stride, padding, dilation)
    ref_shared_f32 = _reference_conv(x, params["s_weight"], params["s_bias"],
                                     stride, padding, dilation)
    np.testing.assert_allclose(np.asarray(y_expert), np.asarray(ref_expert_f32),
                               rtol=5e-2, atol=5e-2)
    np.testing.assert_allclose(np.asarray(y_shared), np.asarray(ref_shared_f32),
                               rtol=5e-2, atol=5e-2)

    print("KERNEL_OK")
</pallas_src>

<mosaic_0001>
module attributes {stable_mosaic.version = 11 : i64} {
  func.func @_conv_matmul_kernel(%arg0: i32, %arg1: memref<8x36xbf16, #tpu.memory_space<vmem>>, %arg2: memref<8x1xf32, #tpu.memory_space<vmem>>, %arg3: memref<36x128xbf16, #tpu.memory_space<vmem>>, %arg4: memref<8x128xbf16, #tpu.memory_space<vmem>>) attributes {dimension_semantics = [#tpu.dimension_semantics<parallel>], iteration_bounds = array<i64: 4>, scalar_prefetch = 0 : i64, scratch_operands = 0 : i64, tpu.core_type = #tpu.core_type<tc>, window_params = [{pipeline_mode = #tpu.pipeline_mode<synchronous>, transform_indices = @transform_0, window_bounds = array<i64: 8, 36>}, {pipeline_mode = #tpu.pipeline_mode<synchronous>, transform_indices = @transform_1, window_bounds = array<i64: 8, 1>}, {transform_indices = @transform_2, window_bounds = array<i64: 36, 128>}, {transform_indices = @transform_3, window_bounds = array<i64: 8, 128>}]} {
    %c0 = arith.constant 0 : index
    %c0_0 = arith.constant 0 : index
    %0 = vector.load %arg1[%c0, %c0_0] : memref<8x36xbf16, #tpu.memory_space<vmem>>, vector<8x36xbf16>
    %c0_1 = arith.constant 0 : index
    %c0_2 = arith.constant 0 : index
    %1 = vector.load %arg3[%c0_1, %c0_2] : memref<36x128xbf16, #tpu.memory_space<vmem>>, vector<36x128xbf16>
    %cst = arith.constant dense<0.000000e+00> : vector<8x128xf32>
    %2 = tpu.matmul %0, %1, %cst {dimension_numbers = #tpu.dot_dimension_numbers<[1], [0], [0], [1], [0, 0, 1, 1], [], []>} : vector<8x36xbf16>, vector<36x128xbf16>, vector<8x128xf32> -> vector<8x128xf32>
    %c0_3 = arith.constant 0 : index
    %c0_4 = arith.constant 0 : index
    %3 = vector.load %arg2[%c0_3, %c0_4] : memref<8x1xf32, #tpu.memory_space<vmem>>, vector<8x1xf32>
    %4 = vector.broadcast %3 : vector<8x1xf32> to vector<8x128xf32>
    %5 = arith.addf %2, %4 : vector<8x128xf32>
    %6 = arith.truncf %5 : vector<8x128xf32> to vector<8x128xbf16>
    %c0_5 = arith.constant 0 : index
    %c0_6 = arith.constant 0 : index
    %7 = vector.load %arg4[%c0_5, %c0_6] : memref<8x128xbf16, #tpu.memory_space<vmem>>, vector<8x128xbf16>
    tpu.vector_store %arg4[%c0_5, %c0_6], %6 {strides = array<i32>} : memref<8x128xbf16, #tpu.memory_space<vmem>>, vector<8x128xbf16>,
    return
  }
  func.func @transform_0(%arg0: i32) -> (i32, i32) {
    %c0_i32 = arith.constant 0 : i32
    %c0_i32_0 = arith.constant 0 : i32
    %c0_i32_1 = arith.constant 0 : i32
    return %c0_i32, %c0_i32_0 : i32, i32
  }
  func.func @transform_1(%arg0: i32) -> (i32, i32) {
    %c0_i32 = arith.constant 0 : i32
    %c0_i32_0 = arith.constant 0 : i32
    %c0_i32_1 = arith.constant 0 : i32
    return %c0_i32, %c0_i32_0 : i32, i32
  }
  func.func @transform_2(%arg0: i32) -> (i32, i32) {
    %c0_i32 = arith.constant 0 : i32
    %c0_i32_0 = arith.constant 0 : i32
    return %c0_i32, %arg0 : i32, i32
  }
  func.func @transform_3(%arg0: i32) -> (i32, i32) {
    %c0_i32 = arith.constant 0 : i32
    %c0_i32_0 = arith.constant 0 : i32
    return %c0_i32, %arg0 : i32, i32
  }
}

</mosaic_0001>

<bundles_post_ra>
// kernel: conv2d_pallas.1
= control target key start
LH: loop header
LB: loop body
LE: loop exit
PB: predicated region body
PF: predicated region fallthrough
CT: control target
= control target key end

     0   :  { %s470_s12 = smov 0   ;;  %s472_s13 = smov 0   ;;  %s530_s0 = inlined_call_operand.vmem [shape: bf16[8,36], index: 0, kind: input, shape index: {}]   ;;  %s531_s1 = inlined_call_operand.vmem [shape: f32[8,1], index: 1, kind: input, shape index: {}]   ;;  %s532_s2 = inlined_call_operand.vmem [shape: bf16[36,512], index: 2, kind: input, shape index: {}]   ;;  %s533_s3 = inlined_call_operand.vmem [shape: bf16[8,512], index: 3, kind: output, shape index: {}]  }
   0x1   :  { %s474_s14 = smov 0  }
   0x2 LB: > { %s363_s15 = sadd.s32 4294967295, %s445_s14   ;;  %s487_s16 = sadd.s32 1, %s445_s14   ;;  %s445_s14 = sphi %s474_s14, %s536_s14   ;;  %s441_s13 = sphi %s472_s13, %s535_s13   ;;  %s437_s12 = sphi %s470_s12, %s534_s12  }
   0x3   : > { %s59_s17 = ssub.s32 %s445_s14, %s487_s16  ;;  %s62_s18 = sadd.s32 1, %s441_s13 }
   0x4   : > { %p60_p0 = scmp.eq.s32.totalorder %s59_s17, 0  ;;  %p69_p1 = scmp.ne.s32.totalorder %s441_s13, %s437_s12 }
   0x5   : > { %p70_p2 = scmp.eq.s32.totalorder %s445_s14, 0  ;;  %p366_p4 = scmp.ge.s32.totalorder %s445_s14, 4 }
   0x6   : > { %s496_s19 = scalar_select %p60_p0, %s441_s13, %s62_s18  }
   0x7   : > { %p71_p3 = por %p70_p2, %p69_p1  ;;  %127 = sbr.rel (%p366_p4) target bundleno = 21 (0x15), region = 24 }
   0xe   : > { %130 = sbr.rel (!%p71_p3) target bundleno = 21 (0x15), region = 28  ;;  %s132_s20 = sand.u32 (%p71_p3), 1, %s441_s13  }
   0xf   : > { %s367_s21 = sshll.u32 (%p71_p3), %s445_s14, 2  ;;  %s390_s22 = smul.u32 (%p71_p3), 20, %s132_s20 }
  0x10   : > { %s136_s25 = scalar_lea.vmem (%p71_p3), %s532_s2, %s367_s21 }
  0x11   : > { %v152_v0 = vld [vmem:[%s136_s25] sm:$0xf] (%p71_p3)  ;;  %v154_v1 = vld [vmem:[%s136_s25 + $0x10] sm:$0xf] (%p71_p3)  ;;  %s134_s26 = scalar_lea.vmem (%p71_p3), [#allocation2], %s390_s22 }
  0x12   : > { %v156_v2 = vld [vmem:[%s136_s25 + $0x20] sm:$0xf] (%p71_p3)  ;;  %v158_v3 = vld [vmem:[%s136_s25 + $0x30] sm:$0xf] (%p71_p3)  ;;  %153 = vst [vmem:[%s134_s26] sm:$0xf] (%p71_p3), %v152_v0 }
  0x13   : > { %v160_v4 = vld [vmem:[%s136_s25 + $0x40] sm:$0xf] (%p71_p3)  ;;  %155 = vst [vmem:[%s134_s26 + $0x4] sm:$0xf] (%p71_p3), %v154_v1  ;;  %157 = vst [vmem:[%s134_s26 + $0x8] sm:$0xf] (%p71_p3), %v156_v2 }
  0x14   : > { %159 = vst [vmem:[%s134_s26 + $0xc] sm:$0xf] (%p71_p3), %v158_v3  ;;  %161 = vst [vmem:[%s134_s26 + $0x10] sm:$0xf] (%p71_p3), %v160_v4 }
  0x15 PF: > { %p368_p5 = scmp.ge.s32.totalorder %s445_s14, 1  ;;  %p193_p6 = scmp.lt.s32.totalorder %s445_s14, 5 }
  0x17   : > { %p194_p7 = pnand %p368_p5, %p193_p6 }
  0x18   : > { %s200_s27 = sand.u32 (!%p194_p7), 1, %s437_s12   ;;  %v447_v5 = vmov (!%p194_p7), 0.0   ;;  %vm448_vm0 = vmmov (!%p194_p7), 0   ;;  %v233_v6 = vld [vmem:[%s531_s1] sm:$0xff] (!%p194_p7)  ;;  %v449_v7 = vmov (!%p194_p7), 0   ;;  %vm258_vm1 = vcmask (!%p194_p7), 1041408  }
  0x19   : > { %197 = sbr.rel (%p194_p7) target bundleno = 258 (0x102), region = 69  ;;  %380 = vmatprep.subr.bf16.mxu0 (!%p194_p7), %v447_v5  ;;  %386 = vmatprep.mubr.msk.bf16.mxu0 (!%p194_p7), %vm448_vm0, %v447_v5  ;;  %v227_v12 = vld [vmem:[%s530_s0] sm:$0xf] (!%p194_p7)  ;;  %vm254_vm2 = vcmask (!%p194_p7), 293888   ;;  %p222_p8 = scmp.lt.s32.totalorder (!%p194_p7), %s363_s15, 3 }
  0x1a   : > { %s391_s28 = smul.u32 (!%p194_p7), 20, %s200_s27  ;;  %419 = vset.pattern.permute.xlu0 (!%p194_p7), %v449_v7 }
  0x1b   : > { %236 = vperm.xlu0 (!%p194_p7), %419, %v233_v6  }
  0x1c   : > { %s202_s4 = scalar_lea.vmem (!%p194_p7), [#allocation2], %s391_s28 }
  0x1d   : > { %v420_v8 = vld [vmem:[%s202_s4] sm:$0xff] (!%p194_p7)   ;;  %v421_v9 = vld [vmem:[%s202_s4 + $0x8] sm:$0xff] (!%p194_p7)   ;;  %v422_v10 = vld [vmem:[%s202_s4 + $0x10] ss:$0 sps:$4 sm:$0x33] (!%p194_p7)  }
  0x1e   : > { %381 = vmatpush3.bf16.msra.mxu0 (!%p194_p7), %v420_v8  ;;  %v260_v11 = vsel (!%p194_p7), %vm258_vm1, %v422_v10, 0 }
  0x1f   : > { %382 = vmatprep.subr.bf16.mxu0 (!%p194_p7), %v447_v5 }
  0x20   : > { %s538_s15 = smov (!%p222_p8, %s363_s15), 3 }
  0x21   : > { %s369_s7 = sshll.u32 %s538_s15, 2 }
  0x22   : > { %383 = vmatpush3.bf16.msra.mxu0 %v421_v9  ;;  %s225_s10 = scalar_lea.vmem %s533_s3, %s369_s7 }
  0x23   : > { %384 = vmatprep.subr.bf16.mxu0 %v447_v5 }
  0x26   : > { %385 = vmatpush3.bf16.msra.mxu0 %v260_v11 }
  0x29   : > { %387 = vmatmul.mubr.msk.bf16.vlgmr.msra.gmra.mrb[0].mxu0 %vm254_vm2, %v227_v12 }
  0x9a   : > { %v237_v13 = vpop.permute.xlu0 %236 }
  0xfc   : > { %v296_v14 = vpop.f32.mrb[0].mxu0 }
  0xfd   : > { %v297_v15 = vadd.f32 %v296_v14, %v237_v13  ;;  %v388_v16 = vpop.f32.mrb[1].mxu0 }
  0xfe   : > { %v299_v17 = vpop.f32.mrb[2].mxu0 }
  0xff   : > { %v302_v18 = vpack.c.bf16 %v297_v15, %v297_v15  ;;  %v389_v19 = vpop.f32.mrb[3].mxu0 }
 0x101   : > { %303 = vst [vmem:[%s225_s10] sm:$0xf] %v302_v18 }
 0x102 PF: > { %p10_p9 = scmp.ge.s32.totalorder %s487_s16, 6   ;;  %s534_s12 = smov %s441_s13 }
 0x103   : > { %s535_s13 = smov %s496_s19  ;;  %s536_s14 = smov %s487_s16 }
 0x104   :  { %12 = sbr.rel (!%p10_p9) target bundleno = 2 (0x2), region = 108 }

</bundles_post_ra>
